<compile_context>
chip_gen: v6e
topology: v6e:2x2x1
jax: 0.10.0
libtpu: 0.0.40
codegen_flags: <defaults>
</compile_context>

<pallas_src>
import functools

import jax
import jax.numpy as jnp
from jax.experimental import pallas as pl
from jax.experimental.pallas import tpu as pltpu


def _round_up(n: int, m: int) -> int:
    return ((n + m - 1) // m) * m


def _fused_mlp_kernel(*refs, num_layers: int):
    """Fused (Linear -> ReLU)* -> Linear.

    refs = (x_ref, w1_ref, b1_ref, ..., wN_ref, bN_ref, out_ref).
    All matmuls run on the MXU with f32 accumulation; bias-add / ReLU stay f32.
    """
    x_ref = refs[0]
    o_ref = refs[-1]
    h = x_ref[...]                                     # [TM, K_pad] (bf16)
    for i in range(num_layers):
        w_ref = refs[1 + 2 * i]
        b_ref = refs[2 + 2 * i]
        acc = jnp.dot(h.astype(w_ref.dtype), w_ref[...],
                      preferred_element_type=jnp.float32)
        acc = acc + b_ref[...]                         # [1, out_pad] broadcasts
        if i < num_layers - 1:
            acc = jnp.maximum(acc, 0.0)                # ReLU, immediate operand
        h = acc
    o_ref[...] = h.astype(o_ref.dtype)


def linear_net_forward(x_nchw, params, *, compute_dtype=jnp.bfloat16):
    """Forward pass: Flatten -> (Linear+ReLU) x N -> Linear, fused in one kernel.

    params: list of (W [in, out] f32, b [1, out] f32) per Linear layer.
    Returns f32 logits of shape [B, num_classes].
    """
    B = x_nchw.shape[0]
    x_flat = x_nchw.reshape(B, -1).astype(jnp.float32)     # nn.Flatten()
    K = x_flat.shape[1]
    num_layers = len(params)
    num_classes = params[-1][0].shape[1]

    # Lane-dense padded dims (multiples of 128) for input / every activation slab.
    pdims = [_round_up(K, 128)] + [_round_up(w.shape[1], 128) for w, _ in params]

    # Batch tile: multiple of 8 sublanes, capped at 256 rows (v6e/v7x MXU height).
    TM = min(256, _round_up(B, 8))
    B_pad = _round_up(B, TM)

    # Zero-pad input (extra rows/cols contribute nothing: padded weight rows
    # multiply zeros, padded out-cols get zero weights + zero bias).
    x_pad = jnp.zeros((B_pad, pdims[0]), compute_dtype)
    x_pad = x_pad.at[:B, :K].set(x_flat.astype(compute_dtype))

    padded_params = []
    in_d = K
    for li, (w, b) in enumerate(params):
        out_d = w.shape[1]
        pin, pout = pdims[li], pdims[li + 1]
        w_p = jnp.zeros((pin, pout), compute_dtype).at[:in_d, :out_d].set(
            w.astype(compute_dtype))
        b_p = jnp.zeros((1, pout), jnp.float32).at[:, :out_d].set(
            b.astype(jnp.float32))
        padded_params.append((w_p, b_p))
        in_d = out_d

    grid = (B_pad // TM,)
    in_specs = [pl.BlockSpec((TM, pdims[0]), lambda i: (i, 0))]
    for li in range(num_layers):
        pin, pout = pdims[li], pdims[li + 1]
        in_specs.append(pl.BlockSpec((pin, pout), lambda i: (0, 0)))   # whole W
        in_specs.append(pl.BlockSpec((1, pout), lambda i: (0, 0)))     # whole b
    out_specs = pl.BlockSpec((TM, pdims[-1]), lambda i: (i, 0))

    flops = sum(2 * B_pad * pdims[li] * pdims[li + 1] for li in range(num_layers))
    itemsize = jnp.dtype(compute_dtype).itemsize
    bytes_accessed = (
        B_pad * pdims[0] * itemsize
        + sum(w.size * itemsize + b.size * 4 for w, b in padded_params)
        + B_pad * pdims[-1] * 4)

    kernel = functools.partial(_fused_mlp_kernel, num_layers=num_layers)
    flat_args = [x_pad]
    for w_p, b_p in padded_params:
        flat_args += [w_p, b_p]

    y_pad = pl.pallas_call(
        kernel,
        out_shape=jax.ShapeDtypeStruct((B_pad, pdims[-1]), jnp.float32),
        grid=grid,
        in_specs=in_specs,
        out_specs=out_specs,
        compiler_params=pltpu.CompilerParams(
            dimension_semantics=("parallel",)),
        cost_estimate=pl.CostEstimate(
            flops=flops, transcendentals=0, bytes_accessed=bytes_accessed),
    )(*flat_args)

    # Slice padded rows/lanes back to the logical output (free layout plumbing).
    return y_pad[:B, :num_classes]


def init_linear_net_params(key, input_size, layer_sizes, num_classes):
    """Deterministic parameter init mirroring nn.Linear shapes.

    Returns list of (W [in, out], b [1, out]) per Linear layer; the last maps
    layer_sizes[-1] -> num_classes. Master params kept in f32.
    """
    dims = [input_size] + list(layer_sizes) + [num_classes]
    params = []
    for i in range(len(dims) - 1):
        fan_in, fan_out = dims[i], dims[i + 1]
        key, kw, kb = jax.random.split(key, 3)
        bound = 1.0 / jnp.sqrt(jnp.float32(fan_in))  # PyTorch default uniform bound
        w = jax.random.uniform(kw, (fan_in, fan_out), jnp.float32, -bound, bound)
        b = jax.random.uniform(kb, (1, fan_out), jnp.float32, -bound, bound)
        params.append((w, b))
    return params


def _reference_forward(x_nchw, params):
    B = x_nchw.shape[0]
    h = x_nchw.reshape(B, -1)
    n_layers = len(params)
    for i, (w, b) in enumerate(params):
        h = h @ w + b
        if i != n_layers - 1:
            h = jnp.maximum(h, 0.0)
    return h


if __name__ == "__main__":
    key = jax.random.PRNGKey(0)
    k_x, k_p = jax.random.split(key)

    # Small example consistent with the module: flatten a [B, C, H, W] input.
    B, C, H, W = 2, 4, 16, 16
    input_size = C * H * W          # 1024
    layer_sizes = [64, 32]          # hidden layer sizes
    num_classes = 10

    x = jax.random.normal(k_x, (B, C, H, W), dtype=jnp.float32)
    params = init_linear_net_params(k_p, input_size, layer_sizes, num_classes)

    y = linear_net_forward(x, params)
    y = jax.block_until_ready(y)

    y_ref = _reference_forward(x, params)
    assert y.shape == (B, num_classes), y.shape
    # bf16 matmul inputs with f32 accumulation: relaxed tolerance vs f32 reference.
    assert jnp.allclose(y, y_ref, atol=2e-2, rtol=2e-2), "mismatch vs reference"

    print("KERNEL_OK")
</pallas_src>

<mosaic_0001>
module attributes {stable_mosaic.version = 11 : i64} {
  func.func @_fused_mlp_kernel(%arg0: i32, %arg1: memref<8x1024xbf16, #tpu.memory_space<vmem>>, %arg2: memref<1024x128xbf16, #tpu.memory_space<vmem>>, %arg3: memref<1x128xf32, #tpu.memory_space<vmem>>, %arg4: memref<128x128xbf16, #tpu.memory_space<vmem>>, %arg5: memref<1x128xf32, #tpu.memory_space<vmem>>, %arg6: memref<128x128xbf16, #tpu.memory_space<vmem>>, %arg7: memref<1x128xf32, #tpu.memory_space<vmem>>, %arg8: memref<8x128xf32, #tpu.memory_space<vmem>>) attributes {dimension_semantics = [#tpu.dimension_semantics<parallel>], iteration_bounds = array<i64: 1>, scalar_prefetch = 0 : i64, scratch_operands = 0 : i64, tpu.core_type = #tpu.core_type<tc>, window_params = [{transform_indices = @transform_0, window_bounds = array<i64: 8, 1024>}, {pipeline_mode = #tpu.pipeline_mode<synchronous>, transform_indices = @transform_1, window_bounds = array<i64: 1024, 128>}, {pipeline_mode = #tpu.pipeline_mode<synchronous>, transform_indices = @transform_2, window_bounds = array<i64: 1, 128>}, {pipeline_mode = #tpu.pipeline_mode<synchronous>, transform_indices = @transform_3, window_bounds = array<i64: 128, 128>}, {pipeline_mode = #tpu.pipeline_mode<synchronous>, transform_indices = @transform_4, window_bounds = array<i64: 1, 128>}, {pipeline_mode = #tpu.pipeline_mode<synchronous>, transform_indices = @transform_5, window_bounds = array<i64: 128, 128>}, {pipeline_mode = #tpu.pipeline_mode<synchronous>, transform_indices = @transform_6, window_bounds = array<i64: 1, 128>}, {transform_indices = @transform_7, window_bounds = array<i64: 8, 128>}]} {
    %c0 = arith.constant 0 : index
    %c0_0 = arith.constant 0 : index
    %0 = vector.load %arg1[%c0, %c0_0] : memref<8x1024xbf16, #tpu.memory_space<vmem>>, vector<8x1024xbf16>
    %c0_1 = arith.constant 0 : index
    %c0_2 = arith.constant 0 : index
    %1 = vector.load %arg2[%c0_1, %c0_2] : memref<1024x128xbf16, #tpu.memory_space<vmem>>, vector<1024x128xbf16>
    %cst = arith.constant dense<0.000000e+00> : vector<8x128xf32>
    %2 = tpu.matmul %0, %1, %cst {dimension_numbers = #tpu.dot_dimension_numbers<[1], [0], [0], [1], [0, 0, 1, 1], [], []>} : vector<8x1024xbf16>, vector<1024x128xbf16>, vector<8x128xf32> -> vector<8x128xf32>
    %c0_3 = arith.constant 0 : index
    %c0_4 = arith.constant 0 : index
    %3 = vector.load %arg3[%c0_3, %c0_4] : memref<1x128xf32, #tpu.memory_space<vmem>>, vector<1x128xf32>
    %4 = vector.broadcast %3 : vector<1x128xf32> to vector<8x128xf32>
    %5 = arith.addf %2, %4 : vector<8x128xf32>
    %cst_5 = arith.constant 0.000000e+00 : f32
    %6 = vector.broadcast %cst_5 : f32 to vector<8x128xf32>
    %7 = arith.maximumf %5, %6 : vector<8x128xf32>
    %8 = arith.truncf %7 : vector<8x128xf32> to vector<8x128xbf16>
    %c0_6 = arith.constant 0 : index
    %c0_7 = arith.constant 0 : index
    %9 = vector.load %arg4[%c0_6, %c0_7] : memref<128x128xbf16, #tpu.memory_space<vmem>>, vector<128x128xbf16>
    %cst_8 = arith.constant dense<0.000000e+00> : vector<8x128xf32>
    %10 = tpu.matmul %8, %9, %cst_8 {dimension_numbers = #tpu.dot_dimension_numbers<[1], [0], [0], [1], [0, 0, 1, 1], [], []>} : vector<8x128xbf16>, vector<128x128xbf16>, vector<8x128xf32> -> vector<8x128xf32>
    %c0_9 = arith.constant 0 : index
    %c0_10 = arith.constant 0 : index
    %11 = vector.load %arg5[%c0_9, %c0_10] : memref<1x128xf32, #tpu.memory_space<vmem>>, vector<1x128xf32>
    %12 = vector.broadcast %11 : vector<1x128xf32> to vector<8x128xf32>
    %13 = arith.addf %10, %12 : vector<8x128xf32>
    %cst_11 = arith.constant 0.000000e+00 : f32
    %14 = vector.broadcast %cst_11 : f32 to vector<8x128xf32>
    %15 = arith.maximumf %13, %14 : vector<8x128xf32>
    %16 = arith.truncf %15 : vector<8x128xf32> to vector<8x128xbf16>
    %c0_12 = arith.constant 0 : index
    %c0_13 = arith.constant 0 : index
    %17 = vector.load %arg6[%c0_12, %c0_13] : memref<128x128xbf16, #tpu.memory_space<vmem>>, vector<128x128xbf16>
    %cst_14 = arith.constant dense<0.000000e+00> : vector<8x128xf32>
    %18 = tpu.matmul %16, %17, %cst_14 {dimension_numbers = #tpu.dot_dimension_numbers<[1], [0], [0], [1], [0, 0, 1, 1], [], []>} : vector<8x128xbf16>, vector<128x128xbf16>, vector<8x128xf32> -> vector<8x128xf32>
    %c0_15 = arith.constant 0 : index
    %c0_16 = arith.constant 0 : index
    %19 = vector.load %arg7[%c0_15, %c0_16] : memref<1x128xf32, #tpu.memory_space<vmem>>, vector<1x128xf32>
    %20 = vector.broadcast %19 : vector<1x128xf32> to vector<8x128xf32>
    %21 = arith.addf %18, %20 : vector<8x128xf32>
    %c0_17 = arith.constant 0 : index
    %c0_18 = arith.constant 0 : index
    %22 = vector.load %arg8[%c0_17, %c0_18] : memref<8x128xf32, #tpu.memory_space<vmem>>, vector<8x128xf32>
    tpu.vector_store %arg8[%c0_17, %c0_18], %21 {strides = array<i32>} : memref<8x128xf32, #tpu.memory_space<vmem>>, vector<8x128xf32>,
    return
  }
  func.func @transform_0(%arg0: i32) -> (i32, i32) {
    %c0_i32 = arith.constant 0 : i32
    %c0_i32_0 = arith.constant 0 : i32
    return %arg0, %c0_i32 : i32, i32
  }
  func.func @transform_1(%arg0: i32) -> (i32, i32) {
    %c0_i32 = arith.constant 0 : i32
    %c0_i32_0 = arith.constant 0 : i32
    %c0_i32_1 = arith.constant 0 : i32
    return %c0_i32, %c0_i32_0 : i32, i32
  }
  func.func @transform_2(%arg0: i32) -> (i32, i32) {
    %c0_i32 = arith.constant 0 : i32
    %c0_i32_0 = arith.constant 0 : i32
    %c0_i32_1 = arith.constant 0 : i32
    return %c0_i32, %c0_i32_0 : i32, i32
  }
  func.func @transform_3(%arg0: i32) -> (i32, i32) {
    %c0_i32 = arith.constant 0 : i32
    %c0_i32_0 = arith.constant 0 : i32
    %c0_i32_1 = arith.constant 0 : i32
    return %c0_i32, %c0_i32_0 : i32, i32
  }
  func.func @transform_4(%arg0: i32) -> (i32, i32) {
    %c0_i32 = arith.constant 0 : i32
    %c0_i32_0 = arith.constant 0 : i32
    %c0_i32_1 = arith.constant 0 : i32
    return %c0_i32, %c0_i32_0 : i32, i32
  }
  func.func @transform_5(%arg0: i32) -> (i32, i32) {
    %c0_i32 = arith.constant 0 : i32
    %c0_i32_0 = arith.constant 0 : i32
    %c0_i32_1 = arith.constant 0 : i32
    return %c0_i32, %c0_i32_0 : i32, i32
  }
  func.func @transform_6(%arg0: i32) -> (i32, i32) {
    %c0_i32 = arith.constant 0 : i32
    %c0_i32_0 = arith.constant 0 : i32
    %c0_i32_1 = arith.constant 0 : i32
    return %c0_i32, %c0_i32_0 : i32, i32
  }
  func.func @transform_7(%arg0: i32) -> (i32, i32) {
    %c0_i32 = arith.constant 0 : i32
    %c0_i32_0 = arith.constant 0 : i32
    return %arg0, %c0_i32 : i32, i32
  }
}

</mosaic_0001>

<bundles_post_ra>
// kernel: tpu_custom_call.1
= control target key start
LH: loop header
LB: loop body
LE: loop exit
PB: predicated region body
PF: predicated region fallthrough
CT: control target
= control target key end

     0   :  { %12 = vsyncpa [#allocation3], 0  ;;  %s1578_s0 = inlined_call_operand.hbm [shape: bf16[8,1024], index: 0, kind: input, shape index: {}]   ;;  %s1579_s1 = inlined_call_operand.hbm [shape: bf16[1024,128], index: 1, kind: input, shape index: {}]   ;;  %s1580_s2 = inlined_call_operand.vmem [shape: f32[1,128], index: 2, kind: input, shape index: {}]   ;;  %s1581_s3 = inlined_call_operand.hbm [shape: bf16[128,128], index: 3, kind: input, shape index: {}]   ;;  %s1582_s4 = inlined_call_operand.vmem [shape: f32[1,128], index: 4, kind: input, shape index: {}]   ;;  %s1583_s5 = inlined_call_operand.hbm [shape: bf16[128,128], index: 5, kind: input, shape index: {}]   ;;  %s1584_s6 = inlined_call_operand.vmem [shape: f32[1,128], index: 6, kind: input, shape index: {}]   ;;  %s1585_s7 = inlined_call_operand.hbm [shape: f32[8,128], index: 7, kind: output, shape index: {}]  }
   0x1   :  { %13 = vsyncpa [#allocation6], 0 }
   0x2   :  { %14 = vsyncpa [#allocation9], 0 }
   0x3   :  { %15 = vsyncpa [#allocation4], 0  ;;  %s1478_s24 = smov [#allocation5]  }
   0x4   :  { %s31_s25 = sshll.u32 %s1478_s24, 4  ;;  %s32_s25 = int_to_ptr.vmem [resolvable:$true] %s31_s25 }
   0x5   :  { %s1378_s26 = scalar_lea.vmem %s32_s25, 8192  ;;  %p1383_p1 = scmp.lt.s32.totalorder %s32_s25, %s32_s25 }
   0x6   :  { %p1379_p0 = scmp.ne.s32.totalorder %s32_s25, %s1378_s26  ;;  %p1384_p2 = scmp.lt.s32.totalorder %s1378_s26, %s1378_s26 }
   0x8   :  { %p1385_p3 = por %p1384_p2, %p1383_p1 }
   0xa   :  { %p1386_p4 = pnand %p1385_p3, %p1379_p0 }
   0xc   :  { %1389 = shalt.err (!%p1386_p4)
}
   0xd   :  { %s1479_s27 = smov 64   ;;  %s1480_s28 = smov 4  }
   0xe   :  { %37 = dma.hbm_to_vmem [thread:$0]  %s1579_s1, 8192, %s32_s25, [#allocation6], %s1479_s27, %s1479_s27, %s1480_s28  }
   0xf   :  { %s1481_s8 = smov [#allocation2]   ;;  %s1482_s10 = smov [#allocation7]  }
  0x10   :  { %s22_s9 = sshll.u32 %s1481_s8, 4  ;;  %s45_s11 = sshll.u32 %s1482_s10, 4  ;;  %s23_s9 = int_to_ptr.vmem [resolvable:$true] %s22_s9  ;;  %s46_s11 = int_to_ptr.vmem [resolvable:$true] %s45_s11 }
  0x11   :  { %s1398_s12 = scalar_lea.vmem %s23_s9, 512  ;;  %p1403_p6 = scmp.lt.s32.totalorder %s23_s9, %s23_s9 }
  0x12   :  { %p1399_p5 = scmp.ne.s32.totalorder %s23_s9, %s1398_s12  ;;  %p1404_p7 = scmp.lt.s32.totalorder %s1398_s12, %s1398_s12 }
  0x14   :  { %p1405_p8 = por %p1404_p7, %p1403_p6 }
  0x16   :  { %p1406_p9 = pnand %p1405_p8, %p1399_p5 }
  0x18   :  { %1409 = shalt.err (!%p1406_p9)
}
  0x19   :  { %25 = dma.hbm_to_vmem [thread:$0]  %s1578_s0, 512, %s23_s9, [#allocation3]  }
  0x1a   :  { %s1418_s15 = scalar_lea.vmem %s46_s11, 1024  ;;  %p1423_p11 = scmp.lt.s32.totalorder %s46_s11, %s46_s11 }
  0x1b   :  { %p1419_p10 = scmp.ne.s32.totalorder %s46_s11, %s1418_s15  ;;  %p1424_p12 = scmp.lt.s32.totalorder %s1418_s15, %s1418_s15 }
  0x1d   :  { %p1425_p13 = por %p1424_p12, %p1423_p11 }
  0x1f   :  { %p1426_p0 = pnand %p1425_p13, %p1419_p10 }
  0x21   :  { %1429 = shalt.err (!%p1426_p0)
}
  0x22   :  { %51 = dma.hbm_to_vmem [thread:$0]  %s1581_s3, 1024, %s46_s11, [#allocation6], %s1479_s27, %s1479_s27, %s1480_s28  }
  0x23   :  { %s1483_s17 = smov [#allocation8]  }
  0x24   :  { %s59_s18 = sshll.u32 %s1483_s17, 4  ;;  %s60_s18 = int_to_ptr.vmem [resolvable:$true] %s59_s18 }
  0x25   :  { %s1438_s19 = scalar_lea.vmem %s60_s18, 1024  ;;  %p1443_p2 = scmp.lt.s32.totalorder %s60_s18, %s60_s18 }
  0x26   :  { %p1439_p1 = scmp.ne.s32.totalorder %s60_s18, %s1438_s19  ;;  %p1444_p3 = scmp.lt.s32.totalorder %s1438_s19, %s1438_s19 }
  0x28   :  { %p1445_p4 = por %p1444_p3, %p1443_p2 }
  0x2a   :  { %p1446_p5 = pnand %p1445_p4, %p1439_p1 }
  0x2c   :  { %1449 = shalt.err (!%p1446_p5)
}
  0x2d   :  { %65 = dma.hbm_to_vmem [thread:$0]  %s1583_s5, 1024, %s60_s18, [#allocation9], %s1479_s27, %s1479_s27, %s1480_s28  }
  0x2e   :  { %1470 = dma.done.wait [#allocation3], 512  }
  0x2f   :  { %1471 = vsyncadd [#allocation3], 4294966784 }
  0x30   :  { %1472 = dma.done.wait [#allocation6], 9216  }
  0x31   :  { %1473 = vsyncadd [#allocation6], 4294958080 }
  0x32   :  { %1474 = dma.done.wait [#allocation9], 1024  }
  0x33   :  { %1475 = vsyncadd [#allocation9], 4294966272  ;;  %v1282_v0 = vld [vmem:[#allocation5 + $0x78] sm:$0xff]   ;;  %v1286_v4 = vld [vmem:[#allocation5 + $0x70] sm:$0xff]   ;;  %vm1485_vm0 = vmmov 0   ;;  %s1486_s24 = smov [#allocation10]  }
  0x34   :  { %v1283_v1 = vld [vmem:[#allocation5 + $0xf8] sm:$0xff]   ;;  %1127 = vmatprep.subr.bf16.mxu0 %v1282_v0  ;;  %v1287_v5 = vld [vmem:[#allocation5 + $0xf0] sm:$0xff]   ;;  %v1290_v8 = vld [vmem:[#allocation5 + $0x68] sm:$0xff]   ;;  %s1025_s25 = sshll.u32 %s1486_s24, 4  ;;  %s1026_s25 = int_to_ptr.vmem [resolvable:$true] %s1025_s25 }
  0x35   :  { %v1284_v2 = vld [vmem:[#allocation5 + $0x38] sm:$0xff]   ;;  %1149 = vmatprep.subr.bf16.mxu1 %v1283_v1  ;;  %v1288_v6 = vld [vmem:[#allocation5 + $0x30] sm:$0xff]   ;;  %v1291_v9 = vld [vmem:[#allocation5 + $0xe8] sm:$0xff]   ;;  %p1455_p7 = scmp.lt.s32.totalorder %s1026_s25, %s1026_s25 }
  0x36   :  { %v1285_v3 = vld [vmem:[#allocation5 + $0xb8] sm:$0xff]   ;;  %1128 = vmatpush3.bf16.msra.mxu0 %v1284_v2  ;;  %v1289_v7 = vld [vmem:[#allocation5 + $0xb0] sm:$0xff]   ;;  %v1292_v10 = vld [vmem:[#allocation5 + $0x28] sm:$0xff]  }
  0x37   :  { %1150 = vmatpush3.bf16.msra.mxu1 %v1285_v3  ;;  %1129 = vmatprep.subr.bf16.mxu0 %v1286_v4  ;;  %v1293_v11 = vld [vmem:[#allocation5 + $0xa8] sm:$0xff]   ;;  %v1294_v12 = vld [vmem:[#allocation5 + $0x60] sm:$0xff]   ;;  %v1298_v16 = vld [vmem:[#allocation5 + $0x58] sm:$0xff]  }
  0x38   :  { %1151 = vmatprep.subr.bf16.mxu1 %v1287_v5  ;;  %v1295_v13 = vld [vmem:[#allocation5 + $0xe0] sm:$0xff]   ;;  %v1299_v17 = vld [vmem:[#allocation5 + $0xd8] sm:$0xff]   ;;  %v1302_v20 = vld [vmem:[#allocation5 + $0x50] sm:$0xff]  }
  0x39   :  { %v1296_v14 = vld [vmem:[#allocation5 + $0x20] sm:$0xff]   ;;  %v1300_v18 = vld [vmem:[#allocation5 + $0x18] sm:$0xff]   ;;  %v1303_v21 = vld [vmem:[#allocation5 + $0xd0] sm:$0xff]  }
  0x3a   :  { %1130 = vmatpush3.bf16.msra.mxu0 %v1288_v6  ;;  %v1297_v15 = vld [vmem:[#allocation5 + $0xa0] sm:$0xff]   ;;  %v1301_v19 = vld [vmem:[#allocation5 + $0x98] sm:$0xff]   ;;  %v1304_v22 = vld [vmem:[#allocation5 + $0x10] sm:$0xff]  }
  0x3b   :  { %1152 = vmatpush3.bf16.msra.mxu1 %v1289_v7  ;;  %1131 = vmatprep.subr.bf16.mxu0 %v1290_v8  ;;  %v1305_v23 = vld [vmem:[#allocation5 + $0x90] sm:$0xff]   ;;  %v1306_v24 = vld [vmem:[#allocation5 + $0x48] sm:$0xff]   ;;  %v1310_v28 = vld [vmem:[#allocation5 + $0x40] sm:$0xff]  }
  0x3c   :  { %1153 = vmatprep.subr.bf16.mxu1 %v1291_v9  ;;  %v1307_v25 = vld [vmem:[#allocation5 + $0xc8] sm:$0xff]   ;;  %v1311_v29 = vld [vmem:[#allocation5 + $0xc0] sm:$0xff]   ;;  %v1318_v38 = vld [vmem:[#allocation5 + $0x178] sm:$0xff]  }
  0x3d   :  { %v1308_v26 = vld [vmem:[#allocation5 + $0x8] sm:$0xff]   ;;  %v1312_v30 = vld [vmem:[#allocation5] sm:$0xff]   ;;  %v1319_v39 = vld [vmem:[#allocation5 + $0x1f8] sm:$0xff]  }
  0x3e   :  { %1132 = vmatpush3.bf16.msra.mxu0 %v1292_v10  ;;  %v1309_v27 = vld [vmem:[#allocation5 + $0x88] sm:$0xff]   ;;  %v1313_v31 = vld [vmem:[#allocation5 + $0x80] sm:$0xff]   ;;  %v1320_v40 = vld [vmem:[#allocation5 + $0x138] sm:$0xff]  }
  0x3f   :  { %1154 = vmatpush3.bf16.msra.mxu1 %v1293_v11  ;;  %1133 = vmatprep.subr.bf16.mxu0 %v1294_v12  ;;  %v81_v32 = vld [vmem:[#allocation2] sm:$0xff]  ;;  %v82_v33 = vld [vmem:[#allocation2 + $0x8] sm:$0xff]  ;;  %v1321_v41 = vld [vmem:[#allocation5 + $0x1b8] sm:$0xff]  }
  0x40   :  { %1155 = vmatprep.subr.bf16.mxu1 %v1295_v13  ;;  %v1037_v34 = vcombine.low %v81_v32, %v81_v32  ;;  %v1038_v35 = vcombine.high %v81_v32, %v81_v32  ;;  %v1039_v36 = vcombine.low %v82_v33, %v82_v33  ;;  %v1040_v37 = vcombine.high %v82_v33, %v82_v33  ;;  %v1322_v42 = vld [vmem:[#allocation5 + $0x170] sm:$0xff]   ;;  %v1326_v46 = vld [vmem:[#allocation5 + $0x168] sm:$0xff]   ;;  %v1330_v50 = vld [vmem:[#allocation5 + $0x160] sm:$0xff]  }
  0x41   :  { %v1323_v43 = vld [vmem:[#allocation5 + $0x1f0] sm:$0xff]   ;;  %v1327_v47 = vld [vmem:[#allocation5 + $0x1e8] sm:$0xff]   ;;  %v1331_v51 = vld [vmem:[#allocation5 + $0x1e0] sm:$0xff]   ;;  %v1484_v13 = vmov 0.0  }
  0x42   :  { %1134 = vmatpush3.bf16.msra.mxu0 %v1296_v14  ;;  %664 = vmatprep.mubr.bf16.mxu0 %v1038_v35  ;;  %v1324_v44 = vld [vmem:[#allocation5 + $0x130] sm:$0xff]   ;;  %v1328_v48 = vld [vmem:[#allocation5 + $0x128] sm:$0xff]   ;;  %v1332_v52 = vld [vmem:[#allocation5 + $0x120] sm:$0xff]  }
  0x43   :  { %1156 = vmatpush3.bf16.msra.mxu1 %v1297_v15  ;;  %1135 = vmatprep.subr.bf16.mxu0 %v1298_v16  ;;  %v1325_v45 = vld [vmem:[#allocation5 + $0x1b0] sm:$0xff]   ;;  %v1329_v49 = vld [vmem:[#allocation5 + $0x1a8] sm:$0xff]   ;;  %v1333_v53 = vld [vmem:[#allocation5 + $0x1a0] sm:$0xff]  }
  0x44   :  { %1157 = vmatprep.subr.bf16.mxu1 %v1299_v17  ;;  %704 = vmatprep.mubr.bf16.mxu1 %v1040_v37  ;;  %v1334_v54 = vld [vmem:[#allocation5 + $0x158] sm:$0xff]   ;;  %v1338_v58 = vld [vmem:[#allocation5 + $0x150] sm:$0xff]   ;;  %v1342_v62 = vld [vmem:[#allocation5 + $0x148] sm:$0xff]  }
  0x45   :  { %v1335_v55 = vld [vmem:[#allocation5 + $0x1d8] sm:$0xff]   ;;  %v1339_v59 = vld [vmem:[#allocation5 + $0x1d0] sm:$0xff]   ;;  %v1343_v63 = vld [vmem:[#allocation5 + $0x1c8] sm:$0xff]  }
  0x46   :  { %1136 = vmatpush3.bf16.msra.mxu0 %v1300_v18  ;;  %v1336_v56 = vld [vmem:[#allocation5 + $0x118] sm:$0xff]   ;;  %v1340_v60 = vld [vmem:[#allocation5 + $0x110] sm:$0xff]   ;;  %v1344_v0 = vld [vmem:[#allocation5 + $0x108] sm:$0xff]  }
  0x47   :  { %1158 = vmatpush3.bf16.msra.mxu1 %v1301_v19  ;;  %1137 = vmatprep.subr.bf16.mxu0 %v1302_v20  ;;  %v1337_v57 = vld [vmem:[#allocation5 + $0x198] sm:$0xff]   ;;  %v1341_v61 = vld [vmem:[#allocation5 + $0x190] sm:$0xff]   ;;  %v1345_v1 = vld [vmem:[#allocation5 + $0x188] sm:$0xff]  }
  0x48   :  { %1159 = vmatprep.subr.bf16.mxu1 %v1303_v21  ;;  %v1346_v2 = vld [vmem:[#allocation5 + $0x140] sm:$0xff]   ;;  %v83_v6 = vld [vmem:[#allocation2 + $0x10] sm:$0xff]  ;;  %v84_v9 = vld [vmem:[#allocation2 + $0x18] sm:$0xff] }
  0x49   :  { %v1347_v3 = vld [vmem:[#allocation5 + $0x1c0] sm:$0xff]   ;;  %v1041_v7 = vcombine.low %v83_v6, %v83_v6  ;;  %v1042_v8 = vcombine.high %v83_v6, %v83_v6  ;;  %v1043_v10 = vcombine.low %v84_v9, %v84_v9  ;;  %v1044_v11 = vcombine.high %v84_v9, %v84_v9  ;;  %v1354_v12 = vld [vmem:[#allocation7 + $0x38] sm:$0xff]   ;;  %v1355_v14 = vld [vmem:[#allocation7 + $0x30] sm:$0xff]  }
  0x4a   :  { %1138 = vmatpush3.bf16.msra.mxu0 %v1304_v22  ;;  %v1348_v4 = vld [vmem:[#allocation5 + $0x100] sm:$0xff]   ;;  %v1356_v15 = vld [vmem:[#allocation7 + $0x28] sm:$0xff]   ;;  %v1358_v17 = vld [vmem:[#allocation7 + $0x18] sm:$0xff]  }
  0x4b   :  { %1160 = vmatpush3.bf16.msra.mxu1 %v1305_v23  ;;  %1139 = vmatprep.subr.bf16.mxu0 %v1306_v24  ;;  %v1349_v5 = vld [vmem:[#allocation5 + $0x180] sm:$0xff]   ;;  %v1359_v18 = vld [vmem:[#allocation7 + $0x10] sm:$0xff]   ;;  %v1360_v19 = vld [vmem:[#allocation7 + $0x8] sm:$0xff]  }
  0x4c   :  { %1161 = vmatprep.subr.bf16.mxu1 %v1307_v25  ;;  %v1357_v16 = vld [vmem:[#allocation7 + $0x20] sm:$0xff]   ;;  %v1362_v21 = vld [vmem:[#allocation8 + $0x38] sm:$0xff]   ;;  %v1363_v22 = vld [vmem:[#allocation8 + $0x30] sm:$0xff]  }
  0x4d   :  { %v1361_v20 = vld [vmem:[#allocation7] sm:$0xff]   ;;  %v1364_v23 = vld [vmem:[#allocation8 + $0x28] sm:$0xff]   ;;  %v1366_v25 = vld [vmem:[#allocation8 + $0x18] sm:$0xff]  }
  0x4e   :  { %1140 = vmatpush3.bf16.msra.mxu0 %v1308_v26  ;;  %v1365_v24 = vld [vmem:[#allocation8 + $0x20] sm:$0xff]   ;;  %v1367_v26 = vld [vmem:[#allocation8 + $0x10] sm:$0xff]  }
  0x4f   :  { %1162 = vmatpush3.bf16.msra.mxu1 %v1309_v27  ;;  %1141 = vmatprep.subr.bf16.mxu0 %v1310_v28 }
  0x50   :  { %1163 = vmatprep.subr.bf16.mxu1 %v1311_v29 }
  0x52   :  { %1142 = vmatpush3.bf16.msra.mxu0 %v1312_v30 }
  0x53   :  { %1164 = vmatpush3.bf16.msra.mxu1 %v1313_v31  ;;  %1171 = vmatprep.subr.bf16.mxu0 %v1318_v38 }
  0x54   :  { %1193 = vmatprep.subr.bf16.mxu1 %v1319_v39 }
  0x55   :  { %665 = vmatmul.mubr.bf16.vlgmr.msra.gmra.mxu0 %v1037_v34 }
  0x56   :  { %705 = vmatmul.mubr.bf16.vlgmr.msra.gmra.mxu1 %v1039_v36  ;;  %1172 = vmatpush3.bf16.msra.mxu0 %v1320_v40  ;;  %v1036_v36 = vld [vmem:[%s1580_s2] ss:$0 sm:$0xff] }
  0x57   :  { %1194 = vmatpush3.bf16.msra.mxu1 %v1321_v41  ;;  %1173 = vmatprep.subr.bf16.mxu0 %v1322_v42 }
  0x58   :  { %1195 = vmatprep.subr.bf16.mxu1 %v1323_v43  ;;  %744 = vmatprep.mubr.bf16.mxu0 %v1042_v8 }
  0x59   :  { %784 = vmatprep.mubr.bf16.mxu1 %v1044_v11 }
  0x5a   :  { %1174 = vmatpush3.bf16.msra.mxu0 %v1324_v44 }
  0x5b   :  { %1196 = vmatpush3.bf16.msra.mxu1 %v1325_v45  ;;  %1175 = vmatprep.subr.bf16.mxu0 %v1326_v46 }
  0x5c   :  { %1197 = vmatprep.subr.bf16.mxu1 %v1327_v47 }
  0x5e   :  { %1176 = vmatpush3.bf16.msra.mxu0 %v1328_v48 }
  0x5f   :  { %1198 = vmatpush3.bf16.msra.mxu1 %v1329_v49  ;;  %1177 = vmatprep.subr.bf16.mxu0 %v1330_v50 }
  0x60   :  { %1199 = vmatprep.subr.bf16.mxu1 %v1331_v51 }
  0x62   :  { %1178 = vmatpush3.bf16.msra.mxu0 %v1332_v52 }
  0x63   :  { %1200 = vmatpush3.bf16.msra.mxu1 %v1333_v53  ;;  %1179 = vmatprep.subr.bf16.mxu0 %v1334_v54  ;;  %v1368_v54 = vld [vmem:[#allocation8 + $0x8] sm:$0xff]  }
  0x64   :  { %1201 = vmatprep.subr.bf16.mxu1 %v1335_v55  ;;  %v1369_v55 = vld [vmem:[#allocation8] sm:$0xff]  }
  0x66   :  { %1180 = vmatpush3.bf16.msra.mxu0 %v1336_v56  ;;  %v1109_v56 = vld [vmem:[%s1582_s4] ss:$0 sm:$0xff]  ;;  %s1450_s4 = scalar_lea.vmem %s1026_s25, 128 }
  0x67   :  { %1202 = vmatpush3.bf16.msra.mxu1 %v1337_v57  ;;  %1181 = vmatprep.subr.bf16.mxu0 %v1338_v58  ;;  %p1451_p6 = scmp.ne.s32.totalorder %s1026_s25, %s1450_s4  ;;  %p1456_p8 = scmp.lt.s32.totalorder %s1450_s4, %s1450_s4 }
  0x68   :  { %1203 = vmatprep.subr.bf16.mxu1 %v1339_v59 }
  0x69   :  { %p1457_p9 = por %p1456_p8, %p1455_p7 }
  0x6a   :  { %1182 = vmatpush3.bf16.msra.mxu0 %v1340_v60 }
  0x6b   :  { %1204 = vmatpush3.bf16.msra.mxu1 %v1341_v61  ;;  %1183 = vmatprep.subr.bf16.mxu0 %v1342_v62  ;;  %p1458_p10 = pnand %p1457_p9, %p1451_p6 }
  0x6c   :  { %1205 = vmatprep.subr.bf16.mxu1 %v1343_v63 }
  0x6e   :  { %1184 = vmatpush3.bf16.msra.mxu0 %v1344_v0  ;;  %v1118_v0 = vld [vmem:[%s1584_s6] ss:$0 sm:$0xff] }
  0x6f   :  { %1206 = vmatpush3.bf16.msra.mxu1 %v1345_v1  ;;  %1185 = vmatprep.subr.bf16.mxu0 %v1346_v2 }
  0x70   :  { %1207 = vmatprep.subr.bf16.mxu1 %v1347_v3 }
  0x72   :  { %1186 = vmatpush3.bf16.msra.mxu0 %v1348_v4 }
  0x73   :  { %1208 = vmatpush3.bf16.msra.mxu1 %v1349_v5  ;;  %1233 = vmatprep.subr.bf16.mxu0 %v1484_v13 }
  0x74   :  { %1253 = vmatprep.subr.bf16.mxu1 %v1484_v13 }
  0x75   :  { %745 = vmatmul.mubr.bf16.vlgmr.msra.gmra.mxu0 %v1041_v7 }
  0x76   :  { %785 = vmatmul.mubr.bf16.vlgmr.msra.gmra.mxu1 %v1043_v10  ;;  %1234 = vmatpush3.bf16.msra.mxu0 %v1354_v12 }
  0x77   :  { %1235 = vmatprep.subr.bf16.mxu0 %v1484_v13  ;;  %1249 = vmatprep.mubr.msk.bf16.mxu0 %vm1485_vm0, %v1484_v13 }
  0x78   :  { %1269 = vmatprep.mubr.msk.bf16.mxu1 %vm1485_vm0, %v1484_v13  ;;  %1254 = vmatpush3.bf16.msra.mxu1 %v1362_v21 }
  0x79   :  { %1255 = vmatprep.subr.bf16.mxu1 %v1484_v13 }
  0x7a   :  { %1236 = vmatpush3.bf16.msra.mxu0 %v1355_v14 }
  0x7b   :  { %1237 = vmatprep.subr.bf16.mxu0 %v1484_v13 }
  0x7c   :  { %1256 = vmatpush3.bf16.msra.mxu1 %v1363_v22 }
  0x7d   :  { %1257 = vmatprep.subr.bf16.mxu1 %v1484_v13 }
  0x7e   :  { %1238 = vmatpush3.bf16.msra.mxu0 %v1356_v15 }
  0x7f   :  { %1239 = vmatprep.subr.bf16.mxu0 %v1484_v13 }
  0x80   :  { %1258 = vmatpush3.bf16.msra.mxu1 %v1364_v23 }
  0x81   :  { %1259 = vmatprep.subr.bf16.mxu1 %v1484_v13 }
  0x82   :  { %1240 = vmatpush3.bf16.msra.mxu0 %v1357_v16 }
  0x83   :  { %1241 = vmatprep.subr.bf16.mxu0 %v1484_v13 }
  0x84   :  { %1260 = vmatpush3.bf16.msra.mxu1 %v1365_v24 }
  0x85   :  { %1261 = vmatprep.subr.bf16.mxu1 %v1484_v13 }
  0x86   :  { %1242 = vmatpush3.bf16.msra.mxu0 %v1358_v17 }
  0x87   :  { %1243 = vmatprep.subr.bf16.mxu0 %v1484_v13 }
  0x88   :  { %1262 = vmatpush3.bf16.msra.mxu1 %v1366_v25 }
  0x89   :  { %1263 = vmatprep.subr.bf16.mxu1 %v1484_v13 }
  0x8a   :  { %1244 = vmatpush3.bf16.msra.mxu0 %v1359_v18 }
  0x8b   :  { %1245 = vmatprep.subr.bf16.mxu0 %v1484_v13 }
  0x8c   :  { %1264 = vmatpush3.bf16.msra.mxu1 %v1367_v26 }
  0x8d   :  { %1265 = vmatprep.subr.bf16.mxu1 %v1484_v13 }
  0x8e   :  { %1246 = vmatpush3.bf16.msra.mxu0 %v1360_v19 }
  0x8f   :  { %1247 = vmatprep.subr.bf16.mxu0 %v1484_v13 }
  0x90   :  { %1266 = vmatpush3.bf16.msra.mxu1 %v1368_v54 }
  0x91   :  { %1267 = vmatprep.subr.bf16.mxu1 %v1484_v13 }
  0x92   :  { %1248 = vmatpush3.bf16.msra.mxu0 %v1361_v20 }
  0x94   :  { %1268 = vmatpush3.bf16.msra.mxu1 %v1369_v55 }
 0x115   :  { %v1143_v27 = vpop.f32.mrf.mxu0 }
 0x116   :  { %v1165_v28 = vpop.f32.mrf.mxu1 }
 0x117   :  { %v1144_v29 = vpop.f32.mrf.mxu0 }
 0x118   :  { %v1166_v30 = vpop.f32.mrf.mxu1  ;;  %v1145_v35 = vadd.f32 %v1144_v29, %v1143_v27 }
 0x119   :  { %v1146_v31 = vpop.f32.mrf.mxu0  ;;  %v1167_v38 = vadd.f32 %v1166_v30, %v1165_v28 }
 0x11a   :  { %v1168_v32 = vpop.f32.mrf.mxu1  ;;  %v667_v37 = vadd.f32 %v1145_v35, %v1036_v36 }
 0x11b   :  { %v1147_v33 = vpop.f32.mrf.mxu0 }
 0x11c   :  { %v1169_v34 = vpop.f32.mrf.mxu1  ;;  %v707_v43 = vadd.f32 %v1167_v38, %v667_v37 }
 0x135   :  { %v1187_v39 = vpop.f32.mrf.mxu0 }
 0x136   :  { %v1209_v40 = vpop.f32.mrf.mxu1 }
 0x137   :  { %v1188_v41 = vpop.f32.mrf.mxu0 }
 0x138   :  { %v1210_v42 = vpop.f32.mrf.mxu1  ;;  %v1189_v44 = vadd.f32 %v1188_v41, %v1187_v39 }
 0x139   :  { %v1190_v45 = vpop.f32.mrf.mxu0  ;;  %v1211_v48 = vadd.f32 %v1210_v42, %v1209_v40 }
 0x13a   :  { %v1212_v46 = vpop.f32.mrf.mxu1  ;;  %v747_v47 = vadd.f32 %v1189_v44, %v707_v43 }
 0x13b   :  { %v1191_v49 = vpop.f32.mrf.mxu0 }
 0x13c   :  { %v1213_v50 = vpop.f32.mrf.mxu1  ;;  %v787_v51 = vadd.f32 %v1211_v48, %v747_v47 }
 0x13e   :  { %v792_v52 = vmax.f32 %v787_v51, 0.0 }
 0x140   :  { %v793_v53 = vpack.c.bf16 %v792_v52, %v792_v52 }
 0x142   :  { %1250 = vmatmul.mubr.bf16.vlgmr.msra.gmra.mxu0 %v793_v53 }
 0x202   :  { %v899_v57 = vpop.f32.mrf.mxu0 }
 0x203   :  { %v900_v58 = vadd.f32 %v1109_v56, %v899_v57 }
 0x204   :  { %v1251_v59 = vpop.f32.mrf.mxu0 }
 0x205   :  { %v905_v60 = vmax.f32 %v900_v58, 0.0 }
 0x206   :  { %v902_v61 = vpop.f32.mrf.mxu0 }
 0x207   :  { %v906_v62 = vpack.c.bf16 %v905_v60, %v905_v60 }
 0x208   :  { %v1252_v63 = vpop.f32.mrf.mxu0 }
 0x209   :  { %1270 = vmatmul.mubr.bf16.vlgmr.msra.gmra.mxu1 %v906_v62 }
 0x2c9   :  { %v1012_v1 = vpop.f32.mrf.mxu1 }
 0x2ca   :  { %v1013_v2 = vadd.f32 %v1118_v0, %v1012_v1 }
 0x2cb   :  { %v1271_v3 = vpop.f32.mrf.mxu1 }
 0x2cc   :  { %1018 = vst [vmem:[#allocation10] sm:$0xff] %v1013_v2 }
 0x2cd   :  { %v1015_v4 = vpop.f32.mrf.mxu1 }
 0x2ce   :  { %1461 = shalt.err (!%p1458_p10)
}
 0x2cf   :  { %1028 = dma.vmem_to_hbm [thread:$0]  %s1026_s25, 128, %s1585_s7, [#allocation4]   ;;  %v1272_v5 = vpop.f32.mrf.mxu1 }
 0x2d0   :  { %1476 = dma.done.wait [#allocation4], 128  }
 0x2d1   :  { %1477 = vsyncadd [#allocation4], 4294967168 }
 0x2d2   :  { %1032 = vsyncpa [#allocation3], 1 }
 0x2d3   :  { %1033 = vsyncpa [#allocation6], 1 }
 0x2d4   :  { %1034 = vsyncpa [#allocation9], 1 }
 0x2d5   :  { %1035 = vsyncpa [#allocation4], 1 }

</bundles_post_ra>
